<compile_context>
chip_gen: v6e
topology: v6e:2x2x1
jax: 0.10.0
libtpu: 0.0.40
codegen_flags: <defaults>
</compile_context>

<pallas_src>
from functools import partial

import numpy as np
import jax
import jax.numpy as jnp
from jax.experimental import pallas as pl
from jax.experimental.pallas import tpu as pltpu

# ---------------- configuration (small synthetic shapes) ----------------
B, D1, D2, C = 2, 4, 6, 8          # input  (B, D1, D2, C)
IMG_H, IMG_W = 8, 8                # imageSize=(8, 8)
P = IMG_H * IMG_W                  # mapImage output channels (= H*W = 64)
EPS = 1e-5                         # PyTorch BatchNorm eps


# ---------------- fused kernel: mapImage + BN1 + channel attention ------
def channel_attention_kernel(p_ref, x_ref, w_ref, t_ref, kab_ref, o_ref, *, d1):
    # x:  (D1*D2, C)   one batch element, rows ordered (d1, d2)
    # w:  (C, HW)      BN1-scale-folded map weight
    # t:  (1, HW)      BN1 shift
    # kab:(2*HW, HW)   vstack(Ka, Km) -- 3x3 'same' conv as one K=128 matmul
    # p (SMEM): [conv_bias, bn2_scale, bn2_shift]
    M = jnp.dot(x_ref[...], w_ref[...],
                preferred_element_type=jnp.float32,
                precision=jax.lax.Precision.HIGHEST) + t_ref[...]     # (D1*D2, HW)
    rows = M.shape[0]
    d2 = rows // d1

    # AvgPool3d / MaxPool3d over D1 (static unrolled slices; rows are (d1,d2))
    Fa = M[0:d2, :]
    Fm = M[0:d2, :]
    for i in range(1, d1):
        blk = M[i * d2:(i + 1) * d2, :]
        Fa = Fa + blk
        Fm = jnp.maximum(Fm, blk)
    Fa = Fa * (1.0 / d1)                                              # (D2, HW)

    # Conv3d(2, 1, (1,3,3), padding='same') == single K=128 matmul
    F = jnp.concatenate([Fa, Fm], axis=-1)                            # (D2, 2*HW)
    conv = jnp.dot(F, kab_ref[...],
                   preferred_element_type=jnp.float32,
                   precision=jax.lax.Precision.HIGHEST) + p_ref[0]    # (D2, HW)

    # ELU(alpha=1): exp only on the clamped negative branch (no inf intermediates)
    act = jnp.where(conv > 0.0, conv, jnp.exp(jnp.minimum(conv, 0.0)) - 1.0)
    act = act * p_ref[1] + p_ref[2]          # BatchNorm3d(1), eval-mode affine
    # Dropout: identity (eval mode)

    # AvgPool3d over D2 -> gate; exact sigmoid (approx reciprocal was too lossy)
    gm = jnp.sum(act, axis=0, keepdims=True) * (1.0 / d2)             # (1, HW)
    g = 1.0 / (1.0 + jnp.exp(-gm))                                    # sigmoid

    o_ref[...] = (M * g).astype(o_ref.dtype)        # gate broadcast over (D1, D2)


# ---------------- wrapper ------------------------------------------------
def channel_attention_forward(x, prm):
    Bx, d1, d2, c = x.shape
    hw = prm["w1s"].shape[1]
    x3 = x.reshape(Bx, d1 * d2, c)        # free reshape on HBM

    out = pl.pallas_call(
        partial(channel_attention_kernel, d1=d1),
        out_shape=jax.ShapeDtypeStruct((Bx, d1 * d2, hw), jnp.float32),
        grid=(Bx,),
        in_specs=[
            pl.BlockSpec(memory_space=pltpu.MemorySpace.SMEM),        # [cb, s2, t2]
            pl.BlockSpec((None, d1 * d2, c), lambda b: (b, 0, 0)),    # x, per-batch block
            pl.BlockSpec((c, hw), lambda b: (0, 0)),                  # w1s (grid-invariant)
            pl.BlockSpec((1, hw), lambda b: (0, 0)),                  # t1  (grid-invariant)
            pl.BlockSpec((2 * hw, hw), lambda b: (0, 0)),             # Kab (grid-invariant)
        ],
        out_specs=pl.BlockSpec((None, d1 * d2, hw), lambda b: (b, 0, 0)),
        compiler_params=pltpu.CompilerParams(dimension_semantics=("parallel",)),
    )(prm["conv_scalars"], x3, prm["w1s"], prm["t1"], prm["Kab"])

    return out.reshape(Bx, d1, d2, IMG_H, IMG_W)


# ---------------- parameter construction (deterministic) ----------------
def conv3x3_same_matrix(w33):
    """Encode a 3x3 'same' conv over an HxW grid as a (H*W, H*W) matrix so the
    MACs run on the MXU inside the kernel: out_flat = in_flat @ K."""
    K = np.zeros((P, P), np.float32)
    for h in range(IMG_H):
        for w in range(IMG_W):
            for kh in range(3):
                for kw in range(3):
                    hi, wi = h + kh - 1, w + kw - 1
                    if 0 <= hi < IMG_H and 0 <= wi < IMG_W:
                        K[hi * IMG_W + wi, h * IMG_W + w] += float(w33[kh, kw])
    return jnp.asarray(K)


def make_params(key):
    ks = jax.random.split(key, 11)
    # mapnet: Conv3d(1, P, (C,1,1), bias=False) -> weight (P,1,C,1,1) stored as (C, P)
    w1 = 0.3 * jax.random.normal(ks[0], (C, P), jnp.float32)
    gamma1 = 1.0 + 0.1 * jax.random.normal(ks[1], (P,), jnp.float32)
    beta1 = 0.1 * jax.random.normal(ks[2], (P,), jnp.float32)
    rmean1 = 0.1 * jax.random.normal(ks[3], (P,), jnp.float32)
    rvar1 = 1.0 + 0.1 * jnp.abs(jax.random.normal(ks[4], (P,), jnp.float32))
    s1 = gamma1 / jnp.sqrt(rvar1 + EPS)
    t1 = beta1 - rmean1 * s1

    # conv: Conv3d(2, 1, (1,3,3), padding='same') -> weight (1,2,1,3,3) stored as (2,3,3)
    cw = 0.2 * jax.random.normal(ks[5], (2, 3, 3), jnp.float32)
    cb = 0.05 * jax.random.normal(ks[6], (), jnp.float32)
    gamma2 = 1.0 + 0.1 * jax.random.normal(ks[7], (), jnp.float32)
    beta2 = 0.1 * jax.random.normal(ks[8], (), jnp.float32)
    rmean2 = 0.1 * jax.random.normal(ks[9], (), jnp.float32)
    rvar2 = 1.0 + 0.1 * jnp.abs(jax.random.normal(ks[10], (), jnp.float32))
    s2 = gamma2 / jnp.sqrt(rvar2 + EPS)
    t2 = beta2 - rmean2 * s2

    cw_np = np.asarray(cw)
    Ka = conv3x3_same_matrix(cw_np[0])
    Km = conv3x3_same_matrix(cw_np[1])
    return dict(
        # kernel-ready (folded / fused) parameters
        w1s=w1 * s1.reshape(1, P),                       # BN1 scale folded into weight
        t1=t1.reshape(1, P),
        Kab=jnp.concatenate([Ka, Km], axis=0),           # (2*HW, HW) single K=128 matmul
        conv_scalars=jnp.stack([cb, s2, t2]).astype(jnp.float32),
        # raw parameters for the NumPy reference
        w1=w1, s1=s1.reshape(1, P), cw=cw, cb=cb, s2=s2, t2=t2,
    )


# ---------------- pure-NumPy float64 reference (PyTorch eval semantics) --
def reference_forward(x, prm):
    x = np.asarray(x, np.float64)
    w1 = np.asarray(prm["w1"], np.float64)
    s1 = np.asarray(prm["s1"], np.float64)
    t1 = np.asarray(prm["t1"], np.float64)
    cw = np.asarray(prm["cw"], np.float64)
    cb = float(prm["cb"]); s2 = float(prm["s2"]); t2 = float(prm["t2"])

    Bx, d1, d2, c = x.shape
    Mf = x.reshape(-1, c) @ w1 * s1 + t1                 # mapnet + BN1 (eval)
    M = Mf.reshape(Bx, d1, d2, IMG_H, IMG_W)
    Fa = M.mean(axis=1)                                  # AvgPool over t1
    Fm = M.max(axis=1)                                   # MaxPool over t1
    Fa_p = np.pad(Fa, ((0, 0), (0, 0), (1, 1), (1, 1)))
    Fm_p = np.pad(Fm, ((0, 0), (0, 0), (1, 1), (1, 1)))
    conv = np.full((Bx, d2, IMG_H, IMG_W), cb, np.float64)
    for kh in range(3):
        for kw in range(3):
            conv = (conv
                    + cw[0, kh, kw] * Fa_p[:, :, kh:kh + IMG_H, kw:kw + IMG_W]
                    + cw[1, kh, kw] * Fm_p[:, :, kh:kh + IMG_H, kw:kw + IMG_W])
    act = np.where(conv > 0, conv, np.expm1(np.minimum(conv, 0.0)))   # ELU
    act = act * s2 + t2                                  # BN2 (eval); Dropout = identity
    g = 1.0 / (1.0 + np.exp(-act.mean(axis=1)))          # AvgPool over t2 + sigmoid
    return M * g[:, None, None, :, :]


if __name__ == "__main__":
    key = jax.random.PRNGKey(0)
    kx, kp = jax.random.split(key)
    x = jax.random.normal(kx, (B, D1, D2, C), jnp.float32)
    prm = make_params(kp)

    out = channel_attention_forward(x, prm)
    out = jax.block_until_ready(out)

    ref = reference_forward(np.asarray(x), prm)
    assert out.shape == (B, D1, D2, IMG_H, IMG_W)
    if not np.allclose(np.asarray(out, np.float64), ref, atol=1e-3, rtol=1e-3):
        err = np.max(np.abs(np.asarray(out, np.float64) - ref))
        raise SystemExit(f"mismatch vs reference (max abs err = {err:.3e})")
    print("KERNEL_OK")
</pallas_src>

<mosaic_0001>
module attributes {stable_mosaic.version = 11 : i64} {
  func.func @channel_attention_kernel(%arg0: i32, %arg1: memref<3xf32, #tpu.memory_space<smem>>, %arg2: memref<1x24x8xf32, #tpu.memory_space<vmem>>, %arg3: memref<8x64xf32, #tpu.memory_space<vmem>>, %arg4: memref<1x64xf32, #tpu.memory_space<vmem>>, %arg5: memref<128x64xf32, #tpu.memory_space<vmem>>, %arg6: memref<1x24x64xf32, #tpu.memory_space<vmem>>) attributes {dimension_semantics = [#tpu.dimension_semantics<parallel>], iteration_bounds = array<i64: 2>, scalar_prefetch = 0 : i64, scratch_operands = 0 : i64, tpu.core_type = #tpu.core_type<tc>, window_params = [{transform_indices = @transform_0, window_bounds = array<i64: 3>}, {transform_indices = @transform_1, window_bounds = array<i64: 1, 24, 8>}, {pipeline_mode = #tpu.pipeline_mode<synchronous>, transform_indices = @transform_2, window_bounds = array<i64: 8, 64>}, {pipeline_mode = #tpu.pipeline_mode<synchronous>, transform_indices = @transform_3, window_bounds = array<i64: 1, 64>}, {pipeline_mode = #tpu.pipeline_mode<synchronous>, transform_indices = @transform_4, window_bounds = array<i64: 128, 64>}, {transform_indices = @transform_5, window_bounds = array<i64: 1, 24, 64>}]} {
    %c0 = arith.constant 0 : index
    %c0_0 = arith.constant 0 : index
    %c0_1 = arith.constant 0 : index
    %0 = vector.load %arg2[%c0, %c0_0, %c0_1] : memref<1x24x8xf32, #tpu.memory_space<vmem>>, vector<1x24x8xf32>
    %1 = vector.shape_cast %0 : vector<1x24x8xf32> to vector<24x8xf32>
    %c0_2 = arith.constant 0 : index
    %c0_3 = arith.constant 0 : index
    %2 = vector.load %arg3[%c0_2, %c0_3] : memref<8x64xf32, #tpu.memory_space<vmem>>, vector<8x64xf32>
    %cst = arith.constant dense<0.000000e+00> : vector<24x64xf32>
    %3 = tpu.matmul %1, %2, %cst {dimension_numbers = #tpu.dot_dimension_numbers<[1], [0], [0], [1], [0, 0, 1, 1], [], []>, precision = #tpu.contract_precision<fp32>} : vector<24x8xf32>, vector<8x64xf32>, vector<24x64xf32> -> vector<24x64xf32>
    %c0_4 = arith.constant 0 : index
    %c0_5 = arith.constant 0 : index
    %4 = vector.load %arg4[%c0_4, %c0_5] : memref<1x64xf32, #tpu.memory_space<vmem>>, vector<1x64xf32>
    %5 = vector.broadcast %4 : vector<1x64xf32> to vector<24x64xf32>
    %6 = arith.addf %3, %5 : vector<24x64xf32>
    %7 = vector.extract_strided_slice %6 {offsets = [0, 0], sizes = [6, 64], strides = [1, 1]} : vector<24x64xf32> to vector<6x64xf32>
    %8 = vector.extract_strided_slice %6 {offsets = [0, 0], sizes = [6, 64], strides = [1, 1]} : vector<24x64xf32> to vector<6x64xf32>
    %9 = vector.extract_strided_slice %6 {offsets = [6, 0], sizes = [6, 64], strides = [1, 1]} : vector<24x64xf32> to vector<6x64xf32>
    %10 = arith.addf %7, %9 : vector<6x64xf32>
    %11 = arith.maximumf %8, %9 : vector<6x64xf32>
    %12 = vector.extract_strided_slice %6 {offsets = [12, 0], sizes = [6, 64], strides = [1, 1]} : vector<24x64xf32> to vector<6x64xf32>
    %13 = arith.addf %10, %12 : vector<6x64xf32>
    %14 = arith.maximumf %11, %12 : vector<6x64xf32>
    %15 = vector.extract_strided_slice %6 {offsets = [18, 0], sizes = [6, 64], strides = [1, 1]} : vector<24x64xf32> to vector<6x64xf32>
    %16 = arith.addf %13, %15 : vector<6x64xf32>
    %17 = arith.maximumf %14, %15 : vector<6x64xf32>
    %cst_6 = arith.constant 2.500000e-01 : f32
    %18 = vector.broadcast %cst_6 : f32 to vector<6x64xf32>
    %19 = arith.mulf %16, %18 : vector<6x64xf32>
    %20 = tpu.concatenate %19, %17 in 1 : vector<6x64xf32>, vector<6x64xf32> -> vector<6x128xf32>
    %c0_7 = arith.constant 0 : index
    %c0_8 = arith.constant 0 : index
    %21 = vector.load %arg5[%c0_7, %c0_8] : memref<128x64xf32, #tpu.memory_space<vmem>>, vector<128x64xf32>
    %cst_9 = arith.constant dense<0.000000e+00> : vector<6x64xf32>
    %22 = tpu.matmul %20, %21, %cst_9 {dimension_numbers = #tpu.dot_dimension_numbers<[1], [0], [0], [1], [0, 0, 1, 1], [], []>, precision = #tpu.contract_precision<fp32>} : vector<6x128xf32>, vector<128x64xf32>, vector<6x64xf32> -> vector<6x64xf32>
    %c0_10 = arith.constant 0 : index
    %23 = memref.load %arg1[%c0_10] : memref<3xf32, #tpu.memory_space<smem>>
    %24 = vector.broadcast %23 : f32 to vector<6x64xf32>
    %25 = arith.addf %22, %24 : vector<6x64xf32>
    %cst_11 = arith.constant 0.000000e+00 : f32
    %26 = vector.broadcast %cst_11 : f32 to vector<6x64xf32>
    %27 = arith.cmpf ogt, %25, %26 : vector<6x64xf32>
    %cst_12 = arith.constant 0.000000e+00 : f32
    %28 = vector.broadcast %cst_12 : f32 to vector<6x64xf32>
    %29 = arith.minimumf %25, %28 : vector<6x64xf32>
    %30 = math.exp %29 : vector<6x64xf32>
    %cst_13 = arith.constant 1.000000e+00 : f32
    %31 = vector.broadcast %cst_13 : f32 to vector<6x64xf32>
    %32 = arith.subf %30, %31 : vector<6x64xf32>
    %33 = arith.select %27, %25, %32 : vector<6x64xi1>, vector<6x64xf32>
    %c1 = arith.constant 1 : index
    %34 = memref.load %arg1[%c1] : memref<3xf32, #tpu.memory_space<smem>>
    %35 = vector.broadcast %34 : f32 to vector<6x64xf32>
    %36 = arith.mulf %33, %35 : vector<6x64xf32>
    %c2 = arith.constant 2 : index
    %37 = memref.load %arg1[%c2] : memref<3xf32, #tpu.memory_space<smem>>
    %38 = vector.broadcast %37 : f32 to vector<6x64xf32>
    %39 = arith.addf %36, %38 : vector<6x64xf32>
    %cst_14 = arith.constant dense<0.000000e+00> : vector<64xf32>
    %40 = vector.multi_reduction <add>, %39, %cst_14 [0] : vector<6x64xf32> to vector<64xf32>
    %41 = vector.shape_cast %40 : vector<64xf32> to vector<1x64xf32>
    %cst_15 = arith.constant 0.166666672 : f32
    %42 = vector.broadcast %cst_15 : f32 to vector<1x64xf32>
    %43 = arith.mulf %41, %42 : vector<1x64xf32>
    %cst_16 = arith.constant 0.000000e+00 : f32
    %44 = vector.broadcast %cst_16 : f32 to vector<1x64xf32>
    %45 = arith.subf %44, %43 : vector<1x64xf32>
    %46 = math.exp %45 : vector<1x64xf32>
    %cst_17 = arith.constant 1.000000e+00 : f32
    %47 = vector.broadcast %cst_17 : f32 to vector<1x64xf32>
    %48 = arith.addf %47, %46 : vector<1x64xf32>
    %cst_18 = arith.constant 1.000000e+00 : f32
    %49 = vector.broadcast %cst_18 : f32 to vector<1x64xf32>
    %50 = arith.divf %49, %48 : vector<1x64xf32>
    %51 = vector.broadcast %50 : vector<1x64xf32> to vector<24x64xf32>
    %52 = arith.mulf %6, %51 : vector<24x64xf32>
    %c0_19 = arith.constant 0 : index
    %c0_20 = arith.constant 0 : index
    %c0_21 = arith.constant 0 : index
    %53 = vector.load %arg6[%c0_19, %c0_20, %c0_21] : memref<1x24x64xf32, #tpu.memory_space<vmem>>, vector<1x24x64xf32>
    %54 = vector.shape_cast %53 : vector<1x24x64xf32> to vector<24x64xf32>
    %55 = vector.shape_cast %52 : vector<24x64xf32> to vector<1x24x64xf32>
    tpu.vector_store %arg6[%c0_19, %c0_20, %c0_21], %55 {strides = array<i32>} : memref<1x24x64xf32, #tpu.memory_space<vmem>>, vector<1x24x64xf32>,
    return
  }
  func.func @transform_0(%arg0: i32) -> i32 {
    %c0_i32 = arith.constant 0 : i32
    %c0_i32_0 = arith.constant 0 : i32
    return %c0_i32 : i32
  }
  func.func @transform_1(%arg0: i32) -> (i32, i32, i32) {
    %c0_i32 = arith.constant 0 : i32
    %c0_i32_0 = arith.constant 0 : i32
    %c0_i32_1 = arith.constant 0 : i32
    return %arg0, %c0_i32, %c0_i32_0 : i32, i32, i32
  }
  func.func @transform_2(%arg0: i32) -> (i32, i32) {
    %c0_i32 = arith.constant 0 : i32
    %c0_i32_0 = arith.constant 0 : i32
    %c0_i32_1 = arith.constant 0 : i32
    return %c0_i32, %c0_i32_0 : i32, i32
  }
  func.func @transform_3(%arg0: i32) -> (i32, i32) {
    %c0_i32 = arith.constant 0 : i32
    %c0_i32_0 = arith.constant 0 : i32
    %c0_i32_1 = arith.constant 0 : i32
    return %c0_i32, %c0_i32_0 : i32, i32
  }
  func.func @transform_4(%arg0: i32) -> (i32, i32) {
    %c0_i32 = arith.constant 0 : i32
    %c0_i32_0 = arith.constant 0 : i32
    %c0_i32_1 = arith.constant 0 : i32
    return %c0_i32, %c0_i32_0 : i32, i32
  }
  func.func @transform_5(%arg0: i32) -> (i32, i32, i32) {
    %c0_i32 = arith.constant 0 : i32
    %c0_i32_0 = arith.constant 0 : i32
    %c0_i32_1 = arith.constant 0 : i32
    return %arg0, %c0_i32, %c0_i32_0 : i32, i32, i32
  }
}

</mosaic_0001>

<bundles_post_ra>
// kernel: tpu_custom_call.1
= control target key start
LH: loop header
LB: loop body
LE: loop exit
PB: predicated region body
PF: predicated region fallthrough
CT: control target
= control target key end

     0   :  { %10 = vsyncpa [#allocation4], 0  ;;  %s2791_s0 = inlined_call_operand.vmem [shape: f32[3], index: 0, kind: input, shape index: {}]   ;;  %s2792_s1 = inlined_call_operand.vmem [shape: f32[2,24,8], index: 1, kind: input, shape index: {}]   ;;  %s2793_s2 = inlined_call_operand.vmem [shape: f32[8,64], index: 2, kind: input, shape index: {}]   ;;  %s2794_s3 = inlined_call_operand.vmem [shape: f32[1,64], index: 3, kind: input, shape index: {}]   ;;  %s2795_s4 = inlined_call_operand.vmem [shape: f32[128,64], index: 4, kind: input, shape index: {}]   ;;  %s2796_s5 = inlined_call_operand.hbm [shape: f32[2,24,64], index: 5, kind: output, shape index: {}]  }
   0x1   :  { %11 = vsyncpa [#allocation3], 0 }
   0x2   :  { %13 = vsyncpa [#allocation3 + $0x1], 0  ;;  %s2196_s18 = smov 0   ;;  %s2198_s19 = smov 0  }
   0x3   :  { %s2200_s20 = smov 0   ;;  %s2202_s21 = smov 0  }
   0x4 LB: > { %s2217_s22 = sadd.s32 4294967295, %s2157_s21   ;;  %s1598_s23 = sadd.s32 4294967294, %s2157_s21   ;;  %s2157_s21 = sphi %s2202_s21, %s2817_s21   ;;  %s2153_s20 = sphi %s2200_s20, %s2816_s20   ;;  %s2149_s19 = sphi %s2198_s19, %s2815_s19   ;;  %s2145_s18 = sphi %s2196_s18, %s2814_s18  }
   0x5   : > { %s2221_s24 = sadd.s32 1, %s2157_s21   ;;  %s136_s25 = sadd.s32 1, %s2153_s20 }
   0x6   : > { %s133_s26 = ssub.s32 %s2157_s21, %s2221_s24  ;;  %p146_p0 = scmp.ne.s32.totalorder %s2153_s20, %s2149_s19 }
   0x7   : > { %p134_p1 = scmp.eq.s32.totalorder %s133_s26, 0  ;;  %p147_p2 = scmp.eq.s32.totalorder %s2217_s22, 1 }
   0x8   : > { %p152_p3 = scmp.ne.s32.totalorder %s2149_s19, %s2145_s18  ;;  %p153_p4 = scmp.eq.s32.totalorder %s1598_s23, 1 }
   0x9   : > { %s2232_s27 = scalar_select %p134_p1, %s2153_s20, %s136_s25  }
   0xa   : > { %p2234_p5 = por %p147_p2, %p146_p0  ;;  %p2238_p6 = por %p153_p4, %p152_p3 }
   0xb   : > { %p1599_p7 = scmp.ge.s32.totalorder %s2157_s21, 1  ;;  %p160_p8 = scmp.lt.s32.totalorder %s2157_s21, 3 }
   0xc   : > { %p2031_p9 = scmp.eq.s32.totalorder %s2217_s22, 0  ;;  %s173_s8 = sshll.u32 %s2791_s0, 4  ;;  %s174_s8 = int_to_ptr.vmem [resolvable:$true] %s173_s8 }
   0xd   : > { %p2245_p10 = pnand %p1599_p7, %p160_p8  ;;  %s2078_s9 = scalar_lea.vmem %s174_s8, 16 }
   0xe   : > { %p2079_p13 = scmp.ne.s32.totalorder %s174_s8, %s2078_s9  ;;  %p2086_p3 = scmp.lt.s32.totalorder %s174_s8, %s174_s8 }
   0xf   : > { %p2023_p11 = pneg %p2245_p10  ;;  %p2087_p4 = scmp.lt.s32.totalorder %s2078_s9, %s2078_s9 }
  0x11   : > { %p2024_p12 = pnand %p2031_p9, %p2023_p11  ;;  %p2088_p7 = por %p2087_p4, %p2086_p3 }
  0x13   : > { %p2080_p0 = pneg %p2024_p12 }
  0x15   : > { %p2081_p1 = pnand %p2080_p0, %p2079_p13 }
  0x17   : > { %p2082_p2 = pneg %p2081_p1 }
  0x19   : > { %p2089_p8 = pnand %p2088_p7, %p2082_p2 }
  0x1b   : > { %2092 = shalt.err (!%p2089_p8)
}
  0x1c   : > { %s2159_s10 = smov [#allocation2]   ;;  %203 = sbr.rel (%p2245_p10) target bundleno = 771 (0x303), region = 40 }
  0x1d   : > { %2026 = dma.vmem_to_smem (!%p2024_p12), %s174_s8, 16, %s2159_s10, [#allocation4]  }
  0x21   : > { %2136 = dma.done.wait (%p2031_p9), [#allocation4], 16  }
  0x22   : > { %2138 = vsyncadd (%p2031_p9), [#allocation4], 4294967280 }
  0x23   : > { %209 = sfence }
  0x24   : > { %v240_v0 = vld [vmem:[%s2793_s2] sm:$0xff]  ;;  %p232_p11 = scmp.lt.s32.totalorder %s2217_s22, 1  ;;  %v2160_v1 = vmov 0.0   ;;  %vm2161_vm0 = vmmov 0   ;;  %vm248_vm1 = vcmask 64512   ;;  %v833_v28 = vld [vmem:[%s2795_s4 + $0x78] sm:$0xff] }
  0x25   : > { %1738 = vmatprep.subr.mxu0 %v2160_v1  ;;  %v289_v2 = vand.u32 4294901760, %v240_v0  ;;  %1749 = vmatprep.subr.mxu1 %v2160_v1  ;;  %v832_v29 = vld [vmem:[%s2795_s4 + $0x70] sm:$0xff]  ;;  %v831_v30 = vld [vmem:[%s2795_s4 + $0x68] sm:$0xff]  ;;  %v2327_v31 = vand.u32 4294901760, %v833_v28  ;;  %v830_v34 = vld [vmem:[%s2795_s4 + $0x60] sm:$0xff]  ;;  %vm792_vm2 = vcmask 1041408  }
  0x26   : > { %1740 = vmatprep.mubr.msk.f32.mxu0 %vm2161_vm0, %v2160_v1  ;;  %1751 = vmatprep.mubr.msk.f32.mxu1 %vm2161_vm0, %v2160_v1  ;;  %s233_s13 = scalar_select %p232_p11, %s2217_s22, 1  ;;  %v2329_v32 = vand.u32 4294901760, %v832_v29  ;;  %v2331_v33 = vand.u32 4294901760, %v831_v30  ;;  %v829_v35 = vld [vmem:[%s2795_s4 + $0x58] sm:$0xff]  ;;  %v828_v36 = vld [vmem:[%s2795_s4 + $0x50] sm:$0xff]  ;;  %v2342_v37 = vand.u32 4294901760, %v830_v34 }
  0x27   : > { %1739 = vmatpush3.msra.mxu0 %v289_v2  ;;  %v386_v3 = vsub.f32 %v240_v0, %v289_v2  ;;  %v2344_v38 = vand.u32 4294901760, %v829_v35  ;;  %v2346_v39 = vand.u32 4294901760, %v828_v36  ;;  %v827_v40 = vld [vmem:[%s2795_s4 + $0x48] sm:$0xff]  ;;  %v826_v41 = vld [vmem:[%s2795_s4 + $0x40] sm:$0xff]  ;;  %v2355_v42 = vsub.f32 %v833_v28, %v2327_v31  ;;  %v825_v61 = vld [vmem:[%s2795_s4 + $0x38] sm:$0xff]  ;;  %s2162_s26 = smov 64  }
  0x28   : > { %1760 = vmatprep.subr.mxu0 %v2160_v1  ;;  %s2015_s14 = smul.u32 24, %s233_s13  ;;  %v2358_v43 = vsub.f32 %v832_v29, %v2329_v32  ;;  %v2361_v44 = vsub.f32 %v831_v30, %v2331_v33  ;;  %v2364_v45 = vand.u32 4294901760, %v827_v40  ;;  %v2367_v46 = vsub.f32 %v830_v34, %v2342_v37  ;;  %v824_v62 = vld [vmem:[%s2795_s4 + $0x30] sm:$0xff]  ;;  %v823_v63 = vld [vmem:[%s2795_s4 + $0x28] sm:$0xff]  ;;  %s834_s30 = sld [smem:[#allocation2]] }
  0x29   : > { %v387_v4 = vand.u32 4294901760, %v386_v3  ;;  %v2370_v47 = vsub.f32 %v829_v35, %v2344_v38  ;;  %v2374_v48 = vsub.f32 %v828_v36, %v2346_v39  ;;  %v2376_v49 = vand.u32 4294901760, %v826_v41  ;;  %s1607_s6 = sld [smem:[#allocation2 + $0x1]]  ;;  %s229_s8 = sand.u32 1, %s2149_s19  }
  0x2a   : > { %s236_s17 = scalar_lea.vmem %s2792_s1, %s2015_s14  ;;  %v930_v50 = vand.u32 4294901760, %v2355_v42  ;;  %v937_v51 = vand.u32 4294901760, %v2358_v43  ;;  %v944_v52 = vand.u32 4294901760, %v2361_v44  ;;  %v951_v53 = vand.u32 4294901760, %v2367_v46  ;;  %s1608_s7 = sld [smem:[#allocation2 + $0x2]] }
  0x2b   : > { %v388_v5 = vsub.f32 %v386_v3, %v387_v4  ;;  %v237_v6 = vld [vmem:[%s236_s17] sm:$0xff]  ;;  %v238_v7 = vld [vmem:[%s236_s17 + $0x8] sm:$0xff]  ;;  %v239_v8 = vld [vmem:[%s236_s17 + $0x10] sm:$0xff]  ;;  %v958_v54 = vand.u32 4294901760, %v2370_v47  ;;  %v2386_v55 = vsub.f32 %v827_v40, %v2364_v45  ;;  %v965_v59 = vand.u32 4294901760, %v2374_v48  ;;  %s2014_s9 = smul.u32 24, %s229_s8 }
  0x2c   : > { %v250_v9 = vsel %vm248_vm1, %v237_v6, 0  ;;  %v253_v10 = vsel %vm248_vm1, %v238_v7, 0  ;;  %v256_v11 = vsel %vm248_vm1, %v239_v8, 0  ;;  %v931_v56 = vsub.f32 %v2355_v42, %v930_v50  ;;  %v822_v6 = vld [vmem:[%s2795_s4 + $0x20] sm:$0xff]  ;;  %s2016_s10 = smul.u32 384, %s2217_s22  ;;  %s2751_s22 = scalar_lea.sflag [#allocation3], %s229_s8 }
  0x2d   : > { %v389_v12 = vand.u32 4294901760, %v388_v5  ;;  %v324_v13 = vand.u32 4294901760, %v250_v9  ;;  %v334_v14 = vand.u32 4294901760, %v253_v10  ;;  %v344_v15 = vand.u32 4294901760, %v256_v11  ;;  %s231_s11 = scalar_lea.vmem [#allocation5], %s2014_s9  ;;  %s2163_s17 = smov [#allocation5]  }
  0x2e   : > { %v938_v57 = vsub.f32 %v2358_v43, %v937_v51  ;;  %v945_v58 = vsub.f32 %v2361_v44, %v944_v52  ;;  %v2401_v60 = vsub.f32 %v826_v41, %v2376_v49  ;;  %v932_v0 = vand.u32 4294901760, %v931_v56  ;;  %s1524_s12 = sshll.u32 %s231_s11, 4  ;;  %s2741_s15 = scalar_lea.hbm %s2796_s5, %s2016_s10  ;;  %s2743_s12 = int_to_ptr.vmem [resolvable:$true] %s1524_s12 }
  0x2f   : > { %1750 = vmatpush3.msra.mxu1 %v389_v12  ;;  %v325_v16 = vsub.f32 %v250_v9, %v324_v13  ;;  %v335_v17 = vsub.f32 %v253_v10, %v334_v14  ;;  %v345_v18 = vsub.f32 %v256_v11, %v344_v15  ;;  %v972_v5 = vand.u32 4294901760, %v2386_v55  ;;  %s2093_s16 = scalar_lea.vmem %s2743_s12, 384  ;;  %s2097_s23 = sshll.u32 %s2163_s17, 4  ;;  %s2098_s23 = int_to_ptr.vmem [resolvable:$false] %s2097_s23 }
  0x30   : > { %1752 = vmatmul.mubr.f32.vlgmr.msra.gmra.mxu1 %v324_v13  ;;  %1771 = vmatprep.subr.mxu1 %v2160_v1  ;;  %v946_v7 = vand.u32 4294901760, %v945_v58  ;;  %v2425_v8 = vand.u32 4294901760, %v825_v61  ;;  %v2427_v9 = vand.u32 4294901760, %v824_v62  ;;  %v2429_v10 = vand.u32 4294901760, %v823_v63  ;;  %p2094_p9 = scmp.ne.s32.totalorder %s2743_s12, %s2093_s16  ;;  %s2099_s25 = scalar_lea.vmem %s2098_s23, 768 }
  0x31   : > { %v326_v19 = vand.u32 4294901760, %v325_v16  ;;  %1772 = vmatpush3.msra.mxu1 %v289_v2  ;;  %1754 = vmatprep.mubr.msk.f32.mxu1 %vm2161_vm0, %v2160_v1  ;;  %v336_v20 = vand.u32 4294901760, %v335_v17  ;;  %v346_v23 = vand.u32 4294901760, %v345_v18  ;;  %v966_v11 = vsub.f32 %v2374_v48, %v965_v59  ;;  %p2100_p13 = scmp.lt.s32.totalorder %s2743_s12, %s2098_s23  ;;  %p2101_p0 = scmp.lt.s32.totalorder %s2099_s25, %s2093_s16 }
  0x32   : > { %1793 = vmatprep.subr.mxu1 %v2160_v1  ;;  %v2803_v12 = vand.u32 4294901760, %v2401_v60  ;;  %vm800_vm3 = vcmask 1043456   ;;  %vm816_vm4 = vcmask 523264   ;;  %vm1489_vm6 = vcmask 521216   ;;  %p2095_p10 = pnand %p2094_p9, %p2234_p5 }
  0x33   : > { %v327_v21 = vsub.f32 %v325_v16, %v326_v19  ;;  %v337_v22 = vsub.f32 %v335_v17, %v336_v20  ;;  %v347_v26 = vsub.f32 %v345_v18, %v346_v23  ;;  %p2102_p1 = por %p2101_p0, %p2100_p13 }
  0x34   : > { %1755 = vmatmul.mubr.f32.gmra.mxu1 %v334_v14  ;;  %p2096_p12 = pneg %p2095_p10 }
  0x35   : > { %v328_v24 = vand.u32 4294901760, %v327_v21  ;;  %1757 = vmatprep.mubr.msk.f32.mxu1 %vm2161_vm0, %v2160_v1  ;;  %v338_v25 = vand.u32 4294901760, %v337_v22  ;;  %v348_v27 = vand.u32 4294901760, %v347_v26  ;;  %v2460_v22 = vsub.f32 %v823_v63, %v2429_v10 }
  0x36   : > { %p2103_p2 = pnand %p2102_p1, %p2096_p12 }
  0x37   : > { %1741 = vmatmul.mubr.f32.vlgmr.msra.gmra.mxu0 %v328_v24  ;;  %v967_v24 = vand.u32 4294901760, %v966_v11  ;;  %v2800_v34 = vand.u32 4294901760, %v2460_v22 }
  0x38   : > { %1761 = vmatpush3.msra.mxu0 %v386_v3  ;;  %1743 = vmatprep.mubr.msk.f32.mxu0 %vm2161_vm0, %v2160_v1  ;;  %v952_v3 = vsub.f32 %v2367_v46, %v951_v53 }
  0x39   : > { %1758 = vmatmul.mubr.f32.gmra.mxu1 %v344_v15  ;;  %1782 = vmatprep.subr.mxu0 %v2160_v1  ;;  %v1001_v58 = vsub.f32 %v2460_v22, %v2800_v34 }
  0x3a   : > { %1773 = vmatprep.mubr.msk.f32.mxu1 %vm2161_vm0, %v2160_v1 }
  0x3b   : > { %1744 = vmatmul.mubr.f32.gmra.mxu0 %v338_v25  ;;  %v980_v25 = vsub.f32 %v2401_v60, %v2803_v12 }
  0x3c   : > { %1746 = vmatprep.mubr.msk.f32.mxu0 %vm2161_vm0, %v2160_v1 }
  0x3d   : > { %1774 = vmatmul.mubr.f32.vlgmr.msra.gmra.mxu1 %v326_v19  ;;  %v820_v19 = vld [vmem:[%s2795_s4 + $0x10] sm:$0xff]  ;;  %v981_v36 = vand.u32 4294901760, %v980_v25 }
  0x3e   : > { %1794 = vmatpush3.msra.mxu1 %v289_v2  ;;  %1776 = vmatprep.mubr.msk.f32.mxu1 %vm2161_vm0, %v2160_v1  ;;  %v939_v2 = vand.u32 4294901760, %v938_v57  ;;  %v2474_v28 = vand.u32 4294901760, %v820_v19 }
  0x3f   : > { %1747 = vmatmul.mubr.f32.gmra.mxu0 %v348_v27  ;;  %1839 = vmatprep.subr.mxu1 %v2160_v1 }
  0x40   : > { %1762 = vmatprep.mubr.msk.f32.mxu0 %vm2161_vm0, %v2160_v1  ;;  %v2494_v56 = vsub.f32 %v820_v19, %v2474_v28 }
  0x41   : > { %1777 = vmatmul.mubr.f32.gmra.mxu1 %v336_v20 }
  0x42   : > { %1779 = vmatprep.mubr.msk.f32.mxu1 %vm2161_vm0, %v2160_v1 }
  0x43   : > { %1763 = vmatmul.mubr.f32.vlgmr.msra.gmra.mxu0 %v325_v16  ;;  %v2445_v16 = vsub.f32 %v824_v62, %v2427_v9 }
  0x44   : > { %1783 = vmatpush3.msra.mxu0 %v387_v4  ;;  %1765 = vmatprep.mubr.msk.f32.mxu0 %vm2161_vm0, %v2160_v1  ;;  %v959_v4 = vsub.f32 %v2370_v47, %v958_v54 }
  0x45   : > { %1780 = vmatmul.mubr.f32.gmra.mxu1 %v346_v23  ;;  %1804 = vmatprep.subr.mxu0 %v2160_v1  ;;  %v2801_v26 = vand.u32 4294901760, %v2445_v16 }
  0x46   : > { %1795 = vmatprep.mubr.msk.f32.mxu1 %vm2161_vm0, %v2160_v1  ;;  %v960_v20 = vand.u32 4294901760, %v959_v4 }
  0x47   : > { %1766 = vmatmul.mubr.f32.gmra.mxu0 %v335_v17  ;;  %v2447_v17 = vand.u32 4294901760, %v822_v6  ;;  %v994_v40 = vsub.f32 %v2445_v16, %v2801_v26 }
  0x48   : > { %1768 = vmatprep.mubr.msk.f32.mxu0 %vm2161_vm0, %v2160_v1 }
  0x49   : > { %1796 = vmatmul.mubr.f32.vlgmr.msra.gmra.mxu1 %v324_v13  ;;  %v2472_v27 = vsub.f32 %v822_v6, %v2447_v17  ;;  %v995_v62 = vand.u32 4294901760, %v994_v40 }
  0x4a   : > { %1798 = vmatprep.mubr.msk.f32.mxu1 %vm2161_vm0, %v2160_v1  ;;  %1840 = vmatpush3.msra.mxu1 %v932_v0  ;;  %v2797_v0 = vand.u32 4294901760, %v2494_v56 }
  0x4b   : > { %1769 = vmatmul.mubr.f32.gmra.mxu0 %v345_v18  ;;  %1841 = vmatprep.subr.mxu1 %v2160_v1  ;;  %v973_v18 = vsub.f32 %v2386_v55, %v972_v5  ;;  %v2799_v41 = vand.u32 4294901760, %v2472_v27 }
  0x4c   : > { %1784 = vmatprep.mubr.msk.f32.mxu0 %vm2161_vm0, %v2160_v1  ;;  %1842 = vmatpush3.msra.mxu1 %v939_v2  ;;  %v1002_v2 = vand.u32 4294901760, %v1001_v58  ;;  %v1022_v6 = vsub.f32 %v2494_v56, %v2797_v0 }
  0x4d   : > { %1799 = vmatmul.mubr.f32.gmra.mxu1 %v334_v14  ;;  %1843 = vmatprep.subr.mxu1 %v2160_v1  ;;  %v974_v29 = vand.u32 4294901760, %v973_v18  ;;  %v1008_v63 = vsub.f32 %v2472_v27, %v2799_v41 }
  0x4e   : > { %1801 = vmatprep.mubr.msk.f32.mxu1 %vm2161_vm0, %v2160_v1  ;;  %1844 = vmatpush3.msra.mxu1 %v946_v7  ;;  %v1023_v11 = vand.u32 4294901760, %v1022_v6 }
  0x4f   : > { %1785 = vmatmul.mubr.f32.vlgmr.msra.gmra.mxu0 %v324_v13  ;;  %v821_v13 = vld [vmem:[%s2795_s4 + $0x18] sm:$0xff]  ;;  %1845 = vmatprep.subr.mxu1 %v2160_v1  ;;  %v1009_v4 = vand.u32 4294901760, %v1008_v63 }
  0x50   : > { %1787 = vmatprep.mubr.msk.f32.mxu0 %vm2161_vm0, %v2160_v1  ;;  %1805 = vmatpush3.msra.mxu0 %v2327_v31  ;;  %v2462_v23 = vand.u32 4294901760, %v821_v13 }
  0x51   : > { %1802 = vmatmul.mubr.f32.gmra.mxu1 %v344_v15  ;;  %1806 = vmatprep.subr.mxu0 %v2160_v1 }
  0x52   : > { %1871 = vmatprep.mubr.msk.f32.mxu1 %vm2161_vm0, %v2160_v1  ;;  %1807 = vmatpush3.msra.mxu0 %v2329_v32  ;;  %v2484_v35 = vsub.f32 %v821_v13, %v2462_v23 }
  0x53   : > { %1788 = vmatmul.mubr.f32.gmra.mxu0 %v334_v14  ;;  %1808 = vmatprep.subr.mxu0 %v2160_v1  ;;  %v953_v14 = vand.u32 4294901760, %v952_v3 }
  0x54   : > { %1790 = vmatprep.mubr.msk.f32.mxu0 %vm2161_vm0, %v2160_v1  ;;  %1809 = vmatpush3.msra.mxu0 %v2331_v33 }
  0x55   : > { %1810 = vmatprep.subr.mxu0 %v2160_v1  ;;  %1846 = vmatpush3.msra.mxu1 %v953_v14 }
  0x56   : > { %1811 = vmatpush3.msra.mxu0 %v2342_v37  ;;  %1847 = vmatprep.subr.mxu1 %v2160_v1 }
  0x57   : > { %1791 = vmatmul.mubr.f32.gmra.mxu0 %v344_v15  ;;  %1812 = vmatprep.subr.mxu0 %v2160_v1  ;;  %v2441_v15 = vsub.f32 %v825_v61, %v2425_v8  ;;  %v2798_v61 = vand.u32 4294901760, %v2484_v35 }
  0x58   : > { %1836 = vmatprep.mubr.msk.f32.mxu0 %vm2161_vm0, %v2160_v1  ;;  %1813 = vmatpush3.msra.mxu0 %v2344_v38 }
  0x59   : > { %1814 = vmatprep.subr.mxu0 %v2160_v1  ;;  %v2802_v21 = vand.u32 4294901760, %v2441_v15  ;;  %1848 = vmatpush3.msra.mxu1 %v960_v20  ;;  %v1015_v3 = vsub.f32 %v2484_v35, %v2798_v61 }
  0x5a   : > { %1815 = vmatpush3.msra.mxu0 %v2346_v39  ;;  %1849 = vmatprep.subr.mxu1 %v2160_v1 }
  0x5b   : > { %1816 = vmatprep.subr.mxu0 %v2160_v1  ;;  %v987_v30 = vsub.f32 %v2441_v15, %v2802_v21  ;;  %1850 = vmatpush3.msra.mxu1 %v967_v24  ;;  %v1016_v7 = vand.u32 4294901760, %v1015_v3 }
  0x5c   : > { %1817 = vmatpush3.msra.mxu0 %v2364_v45  ;;  %1851 = vmatprep.subr.mxu1 %v2160_v1 }
  0x5d   : > { %1818 = vmatprep.subr.mxu0 %v2160_v1  ;;  %1852 = vmatpush3.msra.mxu1 %v974_v29  ;;  %v988_v57 = vand.u32 4294901760, %v987_v30 }
  0x5e   : > { %1819 = vmatpush3.msra.mxu0 %v2376_v49  ;;  %1853 = vmatprep.subr.mxu1 %v2160_v1 }
  0x5f   : > { %1820 = vmatprep.subr.mxu0 %v2160_v1  ;;  %1854 = vmatpush3.msra.mxu1 %v981_v36 }
  0x60   : > { %1821 = vmatpush3.msra.mxu0 %v2425_v8  ;;  %1855 = vmatprep.subr.mxu1 %v2160_v1 }
  0x61   : > { %1822 = vmatprep.subr.mxu0 %v2160_v1  ;;  %1856 = vmatpush3.msra.mxu1 %v988_v57 }
  0x62   : > { %1823 = vmatpush3.msra.mxu0 %v2427_v9  ;;  %1857 = vmatprep.subr.mxu1 %v2160_v1 }
  0x63   : > { %1824 = vmatprep.subr.mxu0 %v2160_v1  ;;  %1858 = vmatpush3.msra.mxu1 %v995_v62  ;;  %v1605_v62 = vld [vmem:[%s2794_s3] ss:$0 sm:$0xff] }
  0x64   : > { %1825 = vmatpush3.msra.mxu0 %v2429_v10  ;;  %1859 = vmatprep.subr.mxu1 %v2160_v1 }
  0x65   : > { %1826 = vmatprep.subr.mxu0 %v2160_v1  ;;  %1860 = vmatpush3.msra.mxu1 %v1002_v2 }
  0x66   : > { %1827 = vmatpush3.msra.mxu0 %v2447_v17  ;;  %1861 = vmatprep.subr.mxu1 %v2160_v1 }
  0x67   : > { %1828 = vmatprep.subr.mxu0 %v2160_v1  ;;  %1862 = vmatpush3.msra.mxu1 %v1009_v4 }
  0x68   : > { %1829 = vmatpush3.msra.mxu0 %v2462_v23  ;;  %1863 = vmatprep.subr.mxu1 %v2160_v1 }
  0x69   : > { %1830 = vmatprep.subr.mxu0 %v2160_v1  ;;  %1864 = vmatpush3.msra.mxu1 %v1016_v7 }
  0x6a   : > { %1831 = vmatpush3.msra.mxu0 %v2474_v28  ;;  %1865 = vmatprep.subr.mxu1 %v2160_v1 }
  0x6b   : > { %1832 = vmatprep.subr.mxu0 %v2160_v1  ;;  %1866 = vmatpush3.msra.mxu1 %v1023_v11 }
  0x6c   : > { %1867 = vmatprep.subr.mxu1 %v2160_v1 }
  0xf0   : > { %v426_v13 = vpop.f32.mrf.mxu1 }
  0xf2   : > { %v1753_v14 = vpop.f32.mrf.mxu1 }
  0xf4   : > { %v432_v18 = vpop.f32.mrf.mxu1 }
  0xf6   : > { %v1756_v19 = vpop.f32.mrf.mxu1 }
  0xf7   : > { %v330_v20 = vpop.f32.mrf.mxu0 }
  0xf8   : > { %v331_v6 = vadd.f32 %v1605_v62, %v330_v20  ;;  %v818_v20 = vld [vmem:[%s2795_s4] sm:$0xff] }
  0xf9   : > { %v1742_v24 = vpop.f32.mrf.mxu0  ;;  %v438_v25 = vpop.f32.mrf.mxu1 }
  0xfa   : > { %v427_v24 = vadd.f32 %v426_v13, %v331_v6 }
  0xfb   : > { %v340_v29 = vpop.f32.mrf.mxu0  ;;  %v1759_v30 = vpop.f32.mrf.mxu1 }
  0xfc   : > { %v341_v0 = vadd.f32 %v1605_v62, %v340_v29 }
  0xfd   : > { %v1745_v36 = vpop.f32.mrf.mxu0  ;;  %v600_v40 = vpop.f32.mrf.mxu1 }
  0xfe   : > { %v433_v26 = vadd.f32 %v432_v18, %v341_v0 }
  0xff   : > { %v350_v57 = vpop.f32.mrf.mxu0  ;;  %v1775_v58 = vpop.f32.mrf.mxu1 }
 0x100   : > { %v819_v58 = vld [vmem:[%s2795_s4 + $0x8] sm:$0xff] }
 0x101   : > { %v1748_v63 = vpop.f32.mrf.mxu0  ;;  %v608_v2 = vpop.f32.mrf.mxu1 }
 0x102   : > { %v2534_v63 = vand.u32 4294901760, %v819_v58 }
 0x103   : > { %v512_v3 = vpop.f32.mrf.mxu0  ;;  %v1778_v4 = vpop.f32.mrf.mxu1 }
 0x104   : > { %v513_v61 = vadd.f32 %v512_v3, %v427_v24  ;;  %v351_v4 = vadd.f32 %v1605_v62, %v350_v57  ;;  %v2540_v29 = vsub.f32 %v819_v58, %v2534_v63  ;;  %v2542_v3 = vand.u32 4294901760, %v818_v20  ;;  %1833 = vmatpush3.msra.mxu0 %v2534_v63 }
 0x105   : > { %v1764_v7 = vpop.f32.mrf.mxu0  ;;  %v616_v11 = vpop.f32.mrf.mxu1  ;;  %1834 = vmatprep.subr.mxu0 %v2160_v1 }
 0x106   : > { %v601_v6 = vadd.f32 %v600_v40, %v513_v61  ;;  %v1028_v18 = vand.u32 4294901760, %v2540_v29  ;;  %v2548_v57 = vsub.f32 %v818_v20, %v2542_v3  ;;  %1835 = vmatpush3.msra.mxu0 %v2542_v3  ;;  %v439_v62 = vadd.f32 %v438_v25, %v351_v4 }
 0x107   : > { %v519_v14 = vpop.f32.mrf.mxu0  ;;  %v1781_v19 = vpop.f32.mrf.mxu1  ;;  %1874 = vmatprep.subr.mxu0 %v2160_v1 }
 0x108   : > { %v520_v19 = vadd.f32 %v519_v14, %v433_v26  ;;  %v1029_v26 = vsub.f32 %v2540_v29, %v1028_v18  ;;  %v1035_v61 = vand.u32 4294901760, %v2548_v57 }
 0x109   : > { %v1767_v30 = vpop.f32.mrf.mxu0  ;;  %v774_v36 = vpop.f32.mrf.mxu1 }
 0x10a   : > { %v609_v40 = vadd.f32 %v608_v2, %v520_v19  ;;  %v1030_v20 = vand.u32 4294901760, %v1029_v26  ;;  %v1036_v25 = vsub.f32 %v2548_v57, %v1035_v61 }
 0x10b   : > { %v526_v41 = vpop.f32.mrf.mxu0  ;;  %v1797_v34 = vpop.f32.mrf.mxu1 }
 0x10c   : > { %v527_v14 = vadd.f32 %v526_v41, %v439_v62  ;;  %1868 = vmatpush3.msra.mxu1 %v1030_v20 }
 0x10d   : > { %v1770_v7 = vpop.f32.mrf.mxu0  ;;  %v780_v13 = vpop.f32.mrf.mxu1  ;;  %1869 = vmatprep.subr.mxu1 %v2160_v1 }
 0x10e   : > { %v617_v21 = vadd.f32 %v616_v11, %v527_v14 }
 0x10f   : > { %v690_v34 = vpop.f32.mrf.mxu0  ;;  %v1800_v0 = vpop.f32.mrf.mxu1 }
 0x110   : > { %v691_v24 = vadd.f32 %v690_v34, %v601_v6 }
 0x111   : > { %v1786_v30 = vpop.f32.mrf.mxu0  ;;  %v786_v58 = vpop.f32.mrf.mxu1 }
 0x112   : > { %v2559_v4 = vadd.f32 %v774_v36, %v691_v24  ;;  %v1037_v30 = vand.u32 4294901760, %v1036_v25 }
 0x113   : > { %v696_v7 = vpop.f32.mrf.mxu0  ;;  %v1803_v0 = vpop.f32.mrf.mxu1 }
 0x114   : > { %v697_v6 = vadd.f32 %v696_v7, %v609_v40  ;;  %1870 = vmatpush3.msra.mxu1 %v1037_v30  ;;  %v793_v41 = vrot.slane %v2559_v4, 6 }
 0x115   : > { %v1789_v34 = vpop.f32.mrf.mxu0  ;;  %1909 = vmatprep.subr.mxu1 %v2160_v1 }
 0x116   : > { %v2561_v12 = vadd.f32 %v780_v13, %v697_v6 }
 0x117   : > { %v702_v2 = vpop.f32.mrf.mxu0 }
 0x118   : > { %v794_v19 = vrot.slane %v2561_v12, 6  ;;  %v703_v62 = vadd.f32 %v702_v2, %v617_v21  ;;  %v801_v11 = vrot.slane %v2561_v12, 4 }
 0x119   : > { %v1792_v36 = vpop.f32.mrf.mxu0 }
 0x11a   : > { %v2567_v24 = vadd.f32 %v786_v58, %v703_v62  ;;  %v795_v26 = vsel %vm792_vm2, %v793_v41, %v794_v19 }
 0x11b   : > { %v797_v40 = vadd.f32 %v795_v26, %v2559_v4  ;;  %v798_v14 = vmax.f32 %v2559_v4, %v795_v26 }
 0x11c   : > { %v802_v13 = vrot.slane %v2567_v24, 4  ;;  %v807_v21 = vrot.slane %v2567_v24, 2 }
 0x11e   : > { %v803_v7 = vsel %vm800_vm3, %v801_v11, %v802_v13 }
 0x11f   : > { %v805_v0 = vadd.f32 %v803_v7, %v797_v40  ;;  %v806_v20 = vmax.f32 %v798_v14, %v803_v7 }
 0x121   : > { %v809_v25 = vadd.f32 %v807_v21, %v805_v0  ;;  %v810_v6 = vmax.f32 %v806_v20, %v807_v21 }
 0x123   : > { %813 = vrot.lane.b32.xlu0 %v810_v6, %s2162_s26  ;;  %v811_v58 = vmul.f32 0.25, %v809_v25 }
 0x195   : > { %v814_v34 = vpop.permute.xlu0 %813 }
 0x196   : > { %v817_v30 = vsel %vm816_vm4, %v811_v58, %v814_v34 }
 0x197   : > { %v2575_v2 = vand.u32 4294901760, %v817_v30 }
 0x199   : > { %v2578_v41 = vsub.f32 %v817_v30, %v2575_v2  ;;  %1872 = vmatmul.mubr.f32.vlgmr.msra.gmra.mxu1 %v2575_v2 }
 0x19a   : > { %1910 = vmatpush3.msra.mxu1 %v2327_v31  ;;  %1941 = vmatprep.mubr.msk.f32.mxu1 %vm2161_vm0, %v2160_v1 }
 0x19b   : > { %v919_v19 = vand.u32 4294901760, %v2578_v41  ;;  %1911 = vmatprep.subr.mxu1 %v2160_v1 }
 0x19c   : > { %1912 = vmatpush3.msra.mxu1 %v2329_v32 }
 0x19d   : > { %v920_v62 = vsub.f32 %v2578_v41, %v919_v19  ;;  %1913 = vmatprep.subr.mxu1 %v2160_v1 }
 0x19e   : > { %1914 = vmatpush3.msra.mxu1 %v2331_v33 }
 0x19f   : > { %v921_v36 = vand.u32 4294901760, %v920_v62  ;;  %1915 = vmatprep.subr.mxu1 %v2160_v1 }
 0x1a0   : > { %1916 = vmatpush3.msra.mxu1 %v2342_v37 }
 0x1a1   : > { %1917 = vmatprep.subr.mxu1 %v2160_v1  ;;  %1837 = vmatmul.mubr.f32.vlgmr.msra.gmra.mxu0 %v921_v36 }
 0x1a2   : > { %1875 = vmatpush3.msra.mxu0 %v2355_v42  ;;  %1918 = vmatpush3.msra.mxu1 %v2344_v38  ;;  %v2813_v42 = vand.u32 4294901760, %v2494_v56 }
 0x1a3   : > { %1876 = vmatprep.subr.mxu0 %v2160_v1  ;;  %1919 = vmatprep.subr.mxu1 %v2160_v1 }
 0x1a4   : > { %1877 = vmatpush3.msra.mxu0 %v2358_v43  ;;  %1920 = vmatpush3.msra.mxu1 %v2346_v39 }
 0x1a5   : > { %1878 = vmatprep.subr.mxu0 %v2160_v1  ;;  %1921 = vmatprep.subr.mxu1 %v2160_v1 }
 0x1a6   : > { %1879 = vmatpush3.msra.mxu0 %v2361_v44  ;;  %1922 = vmatpush3.msra.mxu1 %v2364_v45 }
 0x1a7   : > { %1880 = vmatprep.subr.mxu0 %v2160_v1  ;;  %1923 = vmatprep.subr.mxu1 %v2160_v1 }
 0x1a8   : > { %1881 = vmatpush3.msra.mxu0 %v2367_v46  ;;  %1924 = vmatpush3.msra.mxu1 %v2376_v49 }
 0x1a9   : > { %1882 = vmatprep.subr.mxu0 %v2160_v1  ;;  %1925 = vmatprep.subr.mxu1 %v2160_v1 }
 0x1aa   : > { %1883 = vmatpush3.msra.mxu0 %v2370_v47  ;;  %1926 = vmatpush3.msra.mxu1 %v2425_v8 }
 0x1ab   : > { %1884 = vmatprep.subr.mxu0 %v2160_v1  ;;  %1927 = vmatprep.subr.mxu1 %v2160_v1 }
 0x1ac   : > { %1885 = vmatpush3.msra.mxu0 %v2374_v48  ;;  %1928 = vmatpush3.msra.mxu1 %v2427_v9 }
 0x1ad   : > { %1886 = vmatprep.subr.mxu0 %v2160_v1  ;;  %1929 = vmatprep.subr.mxu1 %v2160_v1 }
 0x1ae   : > { %1887 = vmatpush3.msra.mxu0 %v2386_v55  ;;  %1930 = vmatpush3.msra.mxu1 %v2429_v10 }
 0x1af   : > { %1888 = vmatprep.subr.mxu0 %v2160_v1  ;;  %1931 = vmatprep.subr.mxu1 %v2160_v1 }
 0x1b0   : > { %1889 = vmatpush3.msra.mxu0 %v2401_v60  ;;  %1932 = vmatpush3.msra.mxu1 %v2447_v17 }
 0x1b1   : > { %1890 = vmatprep.subr.mxu0 %v2160_v1  ;;  %1933 = vmatprep.subr.mxu1 %v2160_v1 }
 0x1b2   : > { %1891 = vmatpush3.msra.mxu0 %v2441_v15  ;;  %1934 = vmatpush3.msra.mxu1 %v2462_v23 }
 0x1b3   : > { %1892 = vmatprep.subr.mxu0 %v2160_v1  ;;  %1935 = vmatprep.subr.mxu1 %v2160_v1 }
 0x1b4   : > { %1893 = vmatpush3.msra.mxu0 %v2445_v16  ;;  %1936 = vmatpush3.msra.mxu1 %v2474_v28 }
 0x1b5   : > { %1894 = vmatprep.subr.mxu0 %v2160_v1  ;;  %1937 = vmatprep.subr.mxu1 %v2160_v1 }
 0x1b6   : > { %1895 = vmatpush3.msra.mxu0 %v2460_v22  ;;  %1938 = vmatpush3.msra.mxu1 %v2534_v63 }
 0x1b7   : > { %1896 = vmatprep.subr.mxu0 %v2160_v1  ;;  %1939 = vmatprep.subr.mxu1 %v2160_v1 }
 0x1b8   : > { %1897 = vmatpush3.msra.mxu0 %v2472_v27  ;;  %1940 = vmatpush3.msra.mxu1 %v2542_v3 }
 0x1b9   : > { %1898 = vmatprep.subr.mxu0 %v2160_v1  ;;  %1942 = vmatmul.mubr.f32.vlgmr.msra.gmra.mxu1 %v919_v19 }
 0x1ba   : > { %1979 = vmatprep.subr.mxu1 %v2160_v1  ;;  %1899 = vmatpush3.msra.mxu0 %v2484_v35 }
 0x1bb   : > { %1980 = vmatpush3.msra.mxu1 %v2327_v31  ;;  %1900 = vmatprep.subr.mxu0 %v2160_v1  ;;  %v2807_v31 = vand.u32 4294901760, %v2401_v60 }
 0x1bc   : > { %1981 = vmatprep.subr.mxu1 %v2160_v1  ;;  %1901 = vmatpush3.msra.mxu0 %v2494_v56 }
 0x1bd   : > { %1982 = vmatpush3.msra.mxu1 %v2329_v32  ;;  %1902 = vmatprep.subr.mxu0 %v2160_v1  ;;  %v2808_v32 = vand.u32 4294901760, %v2441_v15 }
 0x1be   : > { %1983 = vmatprep.subr.mxu1 %v2160_v1  ;;  %1903 = vmatpush3.msra.mxu0 %v2540_v29 }
 0x1bf   : > { %1984 = vmatpush3.msra.mxu1 %v2331_v33  ;;  %1904 = vmatprep.subr.mxu0 %v2160_v1  ;;  %v2809_v33 = vand.u32 4294901760, %v2445_v16 }
 0x1c0   : > { %1985 = vmatprep.subr.mxu1 %v2160_v1  ;;  %1905 = vmatpush3.msra.mxu0 %v2548_v57 }
 0x1c1   : > { %1906 = vmatprep.mubr.msk.f32.mxu0 %vm2161_vm0, %v2160_v1  ;;  %1986 = vmatpush3.msra.mxu1 %v2342_v37  ;;  %v2810_v37 = vand.u32 4294901760, %v2460_v22  ;;  %v1484_v22 = vstv %s1607_s6 }
 0x1c2   : > { %1907 = vmatmul.mubr.f32.vlgmr.msra.gmra.mxu0 %v2578_v41  ;;  %1944 = vmatprep.subr.mxu0 %v2160_v1 }
 0x1c3   : > { %1987 = vmatprep.subr.mxu1 %v2160_v1  ;;  %1945 = vmatpush3.msra.mxu0 %v930_v50 }
 0x1c4   : > { %1988 = vmatpush3.msra.mxu1 %v2344_v38  ;;  %1946 = vmatprep.subr.mxu0 %v2160_v1  ;;  %v2811_v38 = vand.u32 4294901760, %v2472_v27  ;;  %v1487_v27 = vstv %s1608_s7 }
 0x1c5   : > { %1989 = vmatprep.subr.mxu1 %v2160_v1  ;;  %1947 = vmatpush3.msra.mxu0 %v937_v51  ;;  %v835_v51 = vstv %s834_s30 }
 0x1c6   : > { %1990 = vmatpush3.msra.mxu1 %v2346_v39  ;;  %1948 = vmatprep.subr.mxu0 %v2160_v1  ;;  %v2812_v39 = vand.u32 4294901760, %v2484_v35 }
 0x1c7   : > { %1991 = vmatprep.subr.mxu1 %v2160_v1  ;;  %1949 = vmatpush3.msra.mxu0 %v944_v52 }
 0x1c8   : > { %1992 = vmatpush3.msra.mxu1 %v2364_v45  ;;  %1950 = vmatprep.subr.mxu0 %v2160_v1 }
 0x1c9   : > { %1993 = vmatprep.subr.mxu1 %v2160_v1  ;;  %1951 = vmatpush3.msra.mxu0 %v951_v53 }
 0x1ca   : > { %1994 = vmatpush3.msra.mxu1 %v2376_v49  ;;  %1952 = vmatprep.subr.mxu0 %v2160_v1 }
 0x1cb   : > { %1995 = vmatprep.subr.mxu1 %v2160_v1  ;;  %1953 = vmatpush3.msra.mxu0 %v958_v54 }
 0x1cc   : > { %1996 = vmatpush3.msra.mxu1 %v2425_v8  ;;  %1954 = vmatprep.subr.mxu0 %v2160_v1 }
 0x1cd   : > { %1997 = vmatprep.subr.mxu1 %v2160_v1  ;;  %1955 = vmatpush3.msra.mxu0 %v965_v59 }
 0x1ce   : > { %1998 = vmatpush3.msra.mxu1 %v2427_v9  ;;  %1956 = vmatprep.subr.mxu0 %v2160_v1 }
 0x1cf   : > { %1999 = vmatprep.subr.mxu1 %v2160_v1  ;;  %1957 = vmatpush3.msra.mxu0 %v972_v5 }
 0x1d0   : > { %2000 = vmatpush3.msra.mxu1 %v2429_v10  ;;  %1958 = vmatprep.subr.mxu0 %v2160_v1 }
 0x1d1   : > { %2001 = vmatprep.subr.mxu1 %v2160_v1  ;;  %1959 = vmatpush3.msra.mxu0 %v2807_v31 }
 0x1d2   : > { %2002 = vmatpush3.msra.mxu1 %v2447_v17  ;;  %1960 = vmatprep.subr.mxu0 %v2160_v1 }
 0x1d3   : > { %2003 = vmatprep.subr.mxu1 %v2160_v1  ;;  %1961 = vmatpush3.msra.mxu0 %v2808_v32 }
 0x1d4   : > { %2004 = vmatpush3.msra.mxu1 %v2462_v23  ;;  %1962 = vmatprep.subr.mxu0 %v2160_v1 }
 0x1d5   : > { %2005 = vmatprep.subr.mxu1 %v2160_v1  ;;  %1963 = vmatpush3.msra.mxu0 %v2809_v33 }
 0x1d6   : > { %2006 = vmatpush3.msra.mxu1 %v2474_v28  ;;  %1964 = vmatprep.subr.mxu0 %v2160_v1 }
 0x1d7   : > { %2007 = vmatprep.subr.mxu1 %v2160_v1  ;;  %1965 = vmatpush3.msra.mxu0 %v2810_v37 }
 0x1d8   : > { %2008 = vmatpush3.msra.mxu1 %v2534_v63  ;;  %1966 = vmatprep.subr.mxu0 %v2160_v1 }
 0x1d9   : > { %2009 = vmatprep.subr.mxu1 %v2160_v1  ;;  %1967 = vmatpush3.msra.mxu0 %v2811_v38 }
 0x1da   : > { %2010 = vmatpush3.msra.mxu1 %v2542_v3  ;;  %2011 = vmatprep.mubr.msk.f32.mxu1 %vm2161_vm0, %v2160_v1 }
 0x1db   : > { %1968 = vmatprep.subr.mxu0 %v2160_v1  ;;  %2012 = vmatmul.mubr.f32.vlgmr.msra.gmra.mxu1 %v2575_v2 }
 0x1dc   : > { %1969 = vmatpush3.msra.mxu0 %v2812_v39  ;;  %1976 = vmatprep.mubr.msk.f32.mxu0 %vm2161_vm0, %v2160_v1 }
 0x1dd   : > { %1970 = vmatprep.subr.mxu0 %v2160_v1 }
 0x1de   : > { %1971 = vmatpush3.msra.mxu0 %v2813_v42 }
 0x1df   : > { %1972 = vmatprep.subr.mxu0 %v2160_v1 }
 0x1e0   : > { %1973 = vmatpush3.msra.mxu0 %v1028_v18 }
 0x1e1   : > { %1974 = vmatprep.subr.mxu0 %v2160_v1 }
 0x1e2   : > { %1975 = vmatpush3.msra.mxu0 %v1035_v61 }
 0x1e3   : > { %1977 = vmatmul.mubr.f32.vlgmr.msra.gmra.mxu0 %v2575_v2 }
 0x259   : > { %v1074_v43 = vpop.f32.mrf.mxu1 }
 0x25b   : > { %v1873_v44 = vpop.f32.mrf.mxu1 }
 0x261   : > { %v923_v45 = vpop.f32.mrf.mxu0 }
 0x262   : > { %v924_v52 = vadd.f32 %v923_v45, %v835_v51 }
 0x263   : > { %v1838_v46 = vpop.f32.mrf.mxu0 }
 0x264   : > { %v1075_v54 = vadd.f32 %v1074_v43, %v924_v52 }
 0x279   : > { %v1267_v47 = vpop.f32.mrf.mxu1 }
 0x27b   : > { %v1943_v48 = vpop.f32.mrf.mxu1 }
 0x282   : > { %v1178_v49 = vpop.f32.mrf.mxu0 }
 0x283   : > { %v1179_v1 = vadd.f32 %v1178_v49, %v1075_v54 }
 0x284   : > { %v1908_v50 = vpop.f32.mrf.mxu0 }
 0x285   : > { %v1268_v59 = vadd.f32 %v1267_v47, %v1179_v1 }
 0x29b   : > { %v1473_v53 = vpop.f32.mrf.mxu1 }
 0x29d   : > { %v2013_v55 = vpop.f32.mrf.mxu1 }
 0x2a3   : > { %v1386_v60 = vpop.f32.mrf.mxu0 }
 0x2a4   : > { %v1387_v5 = vadd.f32 %v1386_v60, %v1268_v59 }
 0x2a5   : > { %v1978_v8 = vpop.f32.mrf.mxu0 }
 0x2a6   : > { %v1474_v9 = vadd.f32 %v1473_v53, %v1387_v5 }
 0x2a8   : > { %v1478_v10 = vmin.f32 %v1474_v9, 0.0  ;;  %vm1477_vm5 = vcmp.gt.f32.partialorder %v1474_v9, 0.0 }
 0x2aa   : > { %v1479_v15 = vmul.f32 1.442695, %v1478_v10 }
 0x2ac   : > { %2072 = vpow2.f32 %v1479_v15 }
 0x2b9   : > { %v2073_v16 = vpop.eup %2072 }
 0x2ba   : > { %v1606_v17 = vadd.f32 -1.0, %v2073_v16 }
 0x2bc   : > { %v1482_v23 = vsel %vm1477_vm5, %v1474_v9, %v1606_v17 }
 0x2bd   : > { %v1485_v28 = vmul.f32 %v1484_v22, %v1482_v23 }
 0x2bf   : > { %v1488_v35 = vadd.f32 %v1487_v27, %v1485_v28 }
 0x2c1   : > { %v1490_v56 = vsel %vm1489_vm6, %v1488_v35, 0.0 }
 0x2c2   : > { %v1491_v63 = vrot.slane %v1490_v56, 4 }
 0x2c4   : > { %v1492_v29 = vadd.f32 %v1491_v63, %v1490_v56 }
 0x2c6   : > { %v1493_v3 = vrot.slane %v1492_v29, 2 }
 0x2c8   : > { %v1494_v18 = vadd.f32 %v1493_v3, %v1492_v29 }
 0x2ca   : > { %v1495_v57 = vrot.slane %v1494_v18, 1 }
 0x2cc   : > { %v1496_v61 = vadd.f32 %v1495_v57, %v1494_v18 }
 0x2ce   : > { %v1497_v26 = vmul.f32 0.16666667, %v1496_v61 }
 0x2d0   : > { %v1498_v11 = vsub.f32 0.0, %v1497_v26 }
 0x2d2   : > { %v1499_v13 = vmul.f32 1.442695, %v1498_v11 }
 0x2d4   : > { %2074 = vpow2.f32 %v1499_v13 }
 0x2e1   : > { %v2075_v40 = vpop.eup %2074 }
 0x2e2   : > { %v1501_v14 = vadd.f32 1.0, %v2075_v40 }
 0x2e4   : > { %2076 = vrcp.f32 %v1501_v14 }
 0x2f1   : > { %v2077_v7 = vpop.eup %2076 }
 0x2f2   : > { %v1504_v0 = vmul.f32 %v2077_v7, %v2559_v4  ;;  %v1505_v20 = vmul.f32 %v2077_v7, %v2561_v12  ;;  %v1506_v21 = vmul.f32 %v2077_v7, %v2567_v24 }
 0x2f4   : > { %1507 = vst.msk [vmem:[%s231_s11] sm:$0xff] %vm816_vm4, %v1504_v0  ;;  %1508 = vst.msk [vmem:[%s231_s11 + $0x8] sm:$0xff] %vm816_vm4, %v1505_v20 }
 0x2f5   : > { %1509 = vst.msk [vmem:[%s231_s11 + $0x10] sm:$0xff] %vm816_vm4, %v1506_v21 }
 0x2f6   : > { %2106 = shalt.err (!%p2103_p2)
}
 0x2f7   : > { %s2107_s26 = scalar_lea.hbm %s2741_s15, 384  ;;  %s2111_s7 = scalar_lea.hbm %s2796_s5, 768 }
 0x2f8   : > { %p2108_p3 = scmp.ne.s32.totalorder %s2741_s15, %s2107_s26  ;;  %p2112_p8 = scmp.lt.s32.totalorder %s2741_s15, %s2796_s5 }
 0x2f9   : > { %p2113_p11 = scmp.lt.s32.totalorder %s2111_s7, %s2107_s26 }
 0x2fa   : > { %p2109_p4 = pnand %p2108_p3, %p2234_p5 }
 0x2fb   : > { %p2114_p9 = por %p2113_p11, %p2112_p8 }
 0x2fc   : > { %p2110_p7 = pneg %p2109_p4 }
 0x2fe   : > { %p2115_p10 = pnand %p2114_p9, %p2110_p7 }
 0x300   : > { %2118 = shalt.err (!%p2115_p10)
}
 0x301   : > { %s2164_s10 = smov 128   ;;  %s2165_s11 = smov 8  }
 0x302   : > { %2021 = dma.vmem_to_hbm [thread:$0]  (%p2234_p5), %s2743_s12, 384, %s2741_s15, %s2751_s22, %s2164_s10, %s2164_s10, %s2165_s11  }
 0x303 PF: > { %p2033_p12 = scmp.ge.s32.totalorder %s2157_s21, 2  ;;  %s1539_s13 = sand.u32 1, %s2145_s18  }
 0x304   : > { %s1540_s14 = scalar_lea.sflag [#allocation3], %s1539_s13 }
 0x305   : > { %p2028_p13 = pnand %p2033_p12, %p2238_p6 }
 0x307   : > { %p2029_p0 = pneg %p2028_p13 }
 0x309   : > { %2140 = dma.done.wait (%p2029_p0), %s1540_s14, 384  }
 0x30a   : > { %2142 = vsyncadd (%p2029_p0), %s1540_s14, 4294966912  ;;  %p16_p1 = scmp.ge.s32.totalorder %s2221_s24, 4   ;;  %s2814_s18 = smov %s2149_s19 }
 0x30b   : > { %s2815_s19 = smov %s2153_s20  ;;  %s2816_s20 = smov %s2232_s27 }
 0x30c   : > { %s2817_s21 = smov %s2221_s24  ;;  %18 = sbr.rel (!%p16_p1) target bundleno = 4 (0x4), region = 80 }
 0x311   :  { %1545 = vsyncpa [#allocation3], 1 }
 0x312   :  { %1547 = vsyncpa [#allocation3 + $0x1], 1 }
 0x313   :  { %1548 = vsyncpa [#allocation4], 1 }
 0x314   :  { %1550 = vsyncpa [#allocation4 + $0x1], 1 }

</bundles_post_ra>
